<compile_context>
chip_gen: v7x
topology: tpu7x:2x2x1
jax: 0.10.0
libtpu: 0.0.40
codegen_flags: <defaults>
</compile_context>

<pallas_src>
import jax
import jax.numpy as jnp
from jax.experimental import pallas as pl
from jax.experimental.pallas import tpu as pltpu

LANE = 128
MAX_TB = 8192  # lanes per tile; mem-bound regime well past the 512-lane roofline knee


def linear_sigmoid_kernel(xT_ref, w_ref, b_ref, o_ref):
    # xT_ref: (4, TB) f32 VMEM tile; w_ref: (4,) f32 SMEM; b_ref: (1,) f32 SMEM;
    # o_ref:  (1, TB) f32 VMEM tile.
    x = xT_ref[...]
    # IN=4, OUT=1 -> pure VPU: 4 scalar-broadcast muls + small add tree (no vmatmul).
    logits = (x[0:1, :] * w_ref[0] + x[1:2, :] * w_ref[1]) + \
             (x[2:3, :] * w_ref[2] + x[3:4, :] * w_ref[3]) + b_ref[0]
    o_ref[...] = jax.nn.sigmoid(logits)


def simple_model_forward(x, weight, bias):
    """x: (B, 4) f32; weight: (1, 4) f32; bias: (1,) f32 -> (B, 1) f32."""
    B, IN = x.shape
    assert IN == 4 and weight.shape == (1, IN) and bias.shape == (1,)

    # Lane-dense: put batch on the lane (last) dim, padded to a multiple of the tile.
    tb = min(MAX_TB, pl.cdiv(B, LANE) * LANE)
    bp = pl.cdiv(B, tb) * tb
    xT = jnp.pad(x.T.astype(jnp.float32), ((0, 0), (0, bp - B)))

    out = pl.pallas_call(
        linear_sigmoid_kernel,
        out_shape=jax.ShapeDtypeStruct((1, bp), jnp.float32),
        grid=(bp // tb,),
        in_specs=[
            pl.BlockSpec((IN, tb), lambda i: (0, i)),               # x^T, tiled over B
            pl.BlockSpec(memory_space=pltpu.MemorySpace.SMEM),      # weight (4,) scalars
            pl.BlockSpec(memory_space=pltpu.MemorySpace.SMEM),      # bias (1,) scalar
        ],
        out_specs=pl.BlockSpec((1, tb), lambda i: (0, i)),
        compiler_params=pltpu.CompilerParams(
            dimension_semantics=("parallel",),  # shards B-tiles across TCs on v7x
        ),
    )(xT, weight.reshape(IN).astype(jnp.float32), bias.astype(jnp.float32))

    # Drop the lane padding and restore the PyTorch (B, 1) output layout.
    return out[0, :B].reshape(B, 1)


if __name__ == "__main__":
    # Deterministic parameters matching SimpleModel.__init__
    weight = jnp.array([[0.3, 0.2, 0.2, 0.3]], dtype=jnp.float32)  # (1, 4)
    bias = jnp.array([0.0], dtype=jnp.float32)                     # (1,)

    # Small deterministic input: batch=8, features=4
    key = jax.random.PRNGKey(0)
    x = jax.random.normal(key, (8, 4), dtype=jnp.float32)

    out = jax.block_until_ready(simple_model_forward(x, weight, bias))

    # Reference check in plain JAX (same math as the PyTorch forward)
    ref = jax.nn.sigmoid(x @ weight.T + bias)
    assert out.shape == (8, 1)
    assert jnp.allclose(out, ref, atol=1e-6, rtol=1e-6)

    print("KERNEL_OK")
</pallas_src>

<mosaic_0001>
module attributes {stable_mosaic.version = 11 : i64} {
  func.func @linear_sigmoid_kernel(%arg0: i32, %arg1: memref<4x128xf32, #tpu.memory_space<vmem>>, %arg2: memref<4xf32, #tpu.memory_space<smem>>, %arg3: memref<1xf32, #tpu.memory_space<smem>>, %arg4: memref<1x128xf32, #tpu.memory_space<vmem>>) attributes {dimension_semantics = [#tpu.dimension_semantics<parallel>], iteration_bounds = array<i64: 1>, scalar_prefetch = 0 : i64, scratch_operands = 0 : i64, tpu.core_type = #tpu.core_type<tc>, window_params = [{transform_indices = @transform_0, window_bounds = array<i64: 4, 128>}, {transform_indices = @transform_1, window_bounds = array<i64: 4>}, {transform_indices = @transform_2, window_bounds = array<i64: 1>}, {transform_indices = @transform_3, window_bounds = array<i64: 1, 128>}]} {
    %c0 = arith.constant 0 : index
    %c0_0 = arith.constant 0 : index
    %0 = vector.load %arg1[%c0, %c0_0] : memref<4x128xf32, #tpu.memory_space<vmem>>, vector<4x128xf32>
    %1 = vector.extract_strided_slice %0 {offsets = [0, 0], sizes = [1, 128], strides = [1, 1]} : vector<4x128xf32> to vector<1x128xf32>
    %c0_1 = arith.constant 0 : index
    %2 = memref.load %arg2[%c0_1] : memref<4xf32, #tpu.memory_space<smem>>
    %3 = vector.broadcast %2 : f32 to vector<1x128xf32>
    %4 = arith.mulf %1, %3 : vector<1x128xf32>
    %5 = vector.extract_strided_slice %0 {offsets = [1, 0], sizes = [1, 128], strides = [1, 1]} : vector<4x128xf32> to vector<1x128xf32>
    %c1 = arith.constant 1 : index
    %6 = memref.load %arg2[%c1] : memref<4xf32, #tpu.memory_space<smem>>
    %7 = vector.broadcast %6 : f32 to vector<1x128xf32>
    %8 = arith.mulf %5, %7 : vector<1x128xf32>
    %9 = arith.addf %4, %8 : vector<1x128xf32>
    %10 = vector.extract_strided_slice %0 {offsets = [2, 0], sizes = [1, 128], strides = [1, 1]} : vector<4x128xf32> to vector<1x128xf32>
    %c2 = arith.constant 2 : index
    %11 = memref.load %arg2[%c2] : memref<4xf32, #tpu.memory_space<smem>>
    %12 = vector.broadcast %11 : f32 to vector<1x128xf32>
    %13 = arith.mulf %10, %12 : vector<1x128xf32>
    %14 = vector.extract_strided_slice %0 {offsets = [3, 0], sizes = [1, 128], strides = [1, 1]} : vector<4x128xf32> to vector<1x128xf32>
    %c3 = arith.constant 3 : index
    %15 = memref.load %arg2[%c3] : memref<4xf32, #tpu.memory_space<smem>>
    %16 = vector.broadcast %15 : f32 to vector<1x128xf32>
    %17 = arith.mulf %14, %16 : vector<1x128xf32>
    %18 = arith.addf %13, %17 : vector<1x128xf32>
    %19 = arith.addf %9, %18 : vector<1x128xf32>
    %c0_2 = arith.constant 0 : index
    %20 = memref.load %arg3[%c0_2] : memref<1xf32, #tpu.memory_space<smem>>
    %21 = vector.broadcast %20 : f32 to vector<1x128xf32>
    %22 = arith.addf %19, %21 : vector<1x128xf32>
    %23 = arith.negf %22 : vector<1x128xf32>
    %24 = math.exp %23 : vector<1x128xf32>
    %cst = arith.constant 1.000000e+00 : f32
    %25 = vector.broadcast %cst : f32 to vector<1x128xf32>
    %26 = arith.addf %25, %24 : vector<1x128xf32>
    %27 = arith.divf %25, %26 : vector<1x128xf32>
    %c0_3 = arith.constant 0 : index
    %c0_4 = arith.constant 0 : index
    %28 = vector.load %arg4[%c0_3, %c0_4] : memref<1x128xf32, #tpu.memory_space<vmem>>, vector<1x128xf32>
    tpu.vector_store %arg4[%c0_3, %c0_4], %27 {strides = array<i32>} : memref<1x128xf32, #tpu.memory_space<vmem>>, vector<1x128xf32>,
    return
  }
  func.func @transform_0(%arg0: i32) -> (i32, i32) {
    %c0_i32 = arith.constant 0 : i32
    %c0_i32_0 = arith.constant 0 : i32
    return %c0_i32, %arg0 : i32, i32
  }
  func.func @transform_1(%arg0: i32) -> i32 {
    %c0_i32 = arith.constant 0 : i32
    %c0_i32_0 = arith.constant 0 : i32
    return %c0_i32 : i32
  }
  func.func @transform_2(%arg0: i32) -> i32 {
    %c0_i32 = arith.constant 0 : i32
    %c0_i32_0 = arith.constant 0 : i32
    return %c0_i32 : i32
  }
  func.func @transform_3(%arg0: i32) -> (i32, i32) {
    %c0_i32 = arith.constant 0 : i32
    %c0_i32_0 = arith.constant 0 : i32
    return %c0_i32, %arg0 : i32, i32
  }
}

</mosaic_0001>

<bundles_post_ra>
// kernel: tpu_custom_call.1
= control target key start
LH: loop header
LB: loop body
LE: loop exit
PB: predicated region body
PF: predicated region fallthrough
CT: control target
= control target key end

     0   :  { %9 = vsyncpa [#allocation4], 0  ;;  %s218_s0 = inlined_call_operand.hbm [shape: f32[4,128], index: 0, kind: input, shape index: {}]   ;;  %s219_s1 = inlined_call_operand.vmem [shape: f32[4], index: 1, kind: input, shape index: {}]   ;;  %s220_s2 = inlined_call_operand.<no memory space> [shape: f32[1], index: 2, kind: input, shape index: {}]   ;;  %s221_s3 = inlined_call_operand.hbm [shape: f32[1,128], index: 3, kind: output, shape index: {}]  }
   0x1   :  { %10 = vsyncpa [#allocation6], 0 }
   0x2   :  { %11 = vsyncpa [#allocation5], 0  ;;  %s28_s14 = sshll.u32 %s219_s1, 4  ;;  %s165_s15 = smov [#allocation3]   ;;  %s29_s14 = int_to_ptr.vmem [resolvable:$true] %s28_s14 }
   0x3   :  { %s18_s16 = sshll.u32 %s165_s15, 4  ;;  %s103_s19 = scalar_lea.hbm %s218_s0, 64  ;;  %s19_s16 = int_to_ptr.vmem [resolvable:$true] %s18_s16 }
   0x4   :  { %p104_p0 = scmp.ne.s32.totalorder %s218_s0, %s103_s19  ;;  %p107_p1 = scmp.lt.u32.totalorder %s103_s19, %s218_s0 }
   0x6   :  { %p109_p2 = pnand %p107_p1, %p104_p0 }
   0x8   :  { %112 = shalt.err (!%p109_p2)
}
   0x9   :  { %s113_s24 = scalar_lea.vmem %s19_s16, 64  ;;  %p118_p4 = scmp.lt.s32.totalorder %s19_s16, %s19_s16 }
   0xa   :  { %p114_p3 = scmp.ne.s32.totalorder %s19_s16, %s113_s24  ;;  %p119_p5 = scmp.lt.s32.totalorder %s113_s24, %s113_s24 }
   0xc   :  { %p120_p6 = por %p119_p5, %p118_p4 }
   0xe   :  { %p121_p7 = pnand %p120_p6, %p114_p3 }
  0x10   :  { %124 = shalt.err (!%p121_p7)
}
  0x11   :  { %21 = dma.hbm_to_vmem [thread:$0]  %s218_s0, 64, %s19_s16, [#allocation4]  }
  0x12   :  { %s125_s26 = scalar_lea.vmem %s29_s14, 16  ;;  %p130_p9 = scmp.lt.s32.totalorder %s29_s14, %s29_s14 }
  0x13   :  { %p126_p8 = scmp.ne.s32.totalorder %s29_s14, %s125_s26  ;;  %p131_p10 = scmp.lt.s32.totalorder %s125_s26, %s125_s26 }
  0x15   :  { %p132_p11 = por %p131_p10, %p130_p9 }
  0x17   :  { %p133_p12 = pnand %p132_p11, %p126_p8 }
  0x19   :  { %136 = shalt.err (!%p133_p12)
}
  0x1a   :  { %s166_s27 = smov [#allocation7]  }
  0x1b   :  { %31 = dma.vmem_to_smem %s29_s14, 16, %s166_s27, [#allocation6]  }
  0x1c   :  { %159 = dma.done.wait [#allocation4], 64  }
  0x1d   :  { %160 = vsyncadd [#allocation4], 4294967232 }
  0x1e   :  { %161 = dma.done.wait [#allocation6], 16  }
  0x1f   :  { %162 = vsyncadd [#allocation6], 4294967280 }
  0x20   :  { %40 = sfence }
  0x21   :  { %s42_s28 = sld [smem:[#allocation7]]  ;;  %s92_s29 = sld [smem:[#allocation7 + $0x1]]  ;;  %v41_v0 = vld [vmem:[#allocation3] sm:$0xf]  ;;  %v67_v14 = vstv %s220_s2 }
  0x22   :  { %s93_s30 = sld [smem:[#allocation7 + $0x2]]  ;;  %s94_s4 = sld [smem:[#allocation7 + $0x3]] }
  0x23   :  { %s167_s6 = smov [#allocation8]  }
  0x24   :  { %s82_s7 = sshll.u32 %s167_s6, 4  ;;  %s83_s7 = int_to_ptr.vmem [resolvable:$true] %s82_s7 }
  0x25   :  { %s137_s8 = scalar_lea.vmem %s83_s7, 16  ;;  %s141_s9 = scalar_lea.vmem %s83_s7, 32 }
  0x26   :  { %p138_p13 = scmp.ne.s32.totalorder %s83_s7, %s137_s8  ;;  %p142_p0 = scmp.lt.s32.totalorder %s83_s7, %s83_s7 }
  0x27   :  { %v43_v1 = vstv %s42_s28  ;;  %v46_v2 = vstv %s92_s29  ;;  %p143_p1 = scmp.lt.s32.totalorder %s141_s9, %s137_s8 }
  0x28   :  { %v47_v3 = vmul.f32 %v46_v2, %v41_v0  ;;  %v53_v4 = vstv %s93_s30  ;;  %v56_v5 = vstv %s94_s4  ;;  %v44_v6 = vmul.f32 %v43_v1, %v41_v0 }
  0x29   :  { %v54_v7 = vmul.f32 %v53_v4, %v41_v0  ;;  %v57_v8 = vmul.f32 %v56_v5, %v41_v0  ;;  %p144_p2 = por %p143_p1, %p142_p0 }
  0x2a   :  { %v49_v9 = vrot.slane %v47_v3, 1 }
  0x2b   :  { %v59_v10 = vrot.slane %v57_v8, 1  ;;  %p145_p3 = pnand %p144_p2, %p138_p13 }
  0x2c   :  { %v51_v11 = vadd.f32 %v49_v9, %v44_v6 }
  0x2d   :  { %v61_v12 = vadd.f32 %v59_v10, %v54_v7 }
  0x2f   :  { %v63_v13 = vrot.slane %v61_v12, 2 }
  0x31   :  { %v65_v15 = vadd.f32 %v63_v13, %v51_v11 }
  0x33   :  { %v68_v16 = vadd.f32 %v67_v14, %v65_v15 }
  0x35   :  { %v95_v17 = vmul.f32 -1.442695, %v68_v16 }
  0x37   :  { %99 = vpow2.f32 %v95_v17 }
  0x41   :  { %v100_v18 = vpop.eup %99 }
  0x42   :  { %v72_v19 = vadd.f32 1.0, %v100_v18 }
  0x44   :  { %101 = vrcp.f32 %v72_v19 }
  0x4e   :  { %v102_v20 = vpop.eup %101 }
  0x4f   :  { %75 = vst [vmem:[#allocation8] sm:$0x1] %v102_v20 }
  0x50   :  { %148 = shalt.err (!%p145_p3)
}
  0x51   :  { %s149_s11 = scalar_lea.hbm %s221_s3, 16 }
  0x52   :  { %p150_p4 = scmp.ne.s32.totalorder %s221_s3, %s149_s11  ;;  %p153_p5 = scmp.lt.u32.totalorder %s149_s11, %s221_s3 }
  0x54   :  { %p155_p6 = pnand %p153_p5, %p150_p4 }
  0x56   :  { %158 = shalt.err (!%p155_p6)
}
  0x57   :  { %85 = dma.vmem_to_hbm [thread:$0]  %s83_s7, 16, %s221_s3, [#allocation5]  }
  0x58   :  { %163 = dma.done.wait [#allocation5], 16  }
  0x59   :  { %164 = vsyncadd [#allocation5], 4294967280 }
  0x5a   :  { %89 = vsyncpa [#allocation4], 1 }
  0x5b   :  { %90 = vsyncpa [#allocation5], 1 }
  0x5c   :  { %91 = vsyncpa [#allocation6], 1 }

</bundles_post_ra>
